<compile_context>
chip_gen: v7x
topology: tpu7x:2x2x1
jax: 0.10.0
libtpu: 0.0.40
codegen_flags: <defaults>
</compile_context>

<pallas_src>
import jax
import jax.numpy as jnp
from jax.experimental import pallas as pl
from jax.experimental.pallas import tpu as pltpu


def _round_up(x, m):
    return (x + m - 1) // m * m


_TB_CAP = 1024  # rows per batch tile; working set stays ~1 MiB << scoped VMEM


def _choose_tb(batch):
    if batch <= 16:
        return max(8, _round_up(batch, 8))          # single-step latency path
    # Target an even tile count so v7x's two TensorCores both get work.
    n_tiles = max(2, 2 * pl.cdiv(pl.cdiv(batch, 2), _TB_CAP))
    return max(8, _round_up(pl.cdiv(batch, n_tiles), 8))


def dqn_kernel(x_ref, w1_ref, b1_ref, w2_ref, b2_ref, w3_ref, b3_ref, o_ref):
    """Fused Linear->ReLU->Linear->ReLU->Linear on one (tb, n_obs) batch tile."""
    cdt = w1_ref.dtype          # f32 or bf16 -- fixed once in prepare_params()
    # layer 1 + ReLU  (Mosaic pads the K=n_obs contraction internally)
    h1 = jnp.dot(x_ref[...].astype(cdt), w1_ref[...],
                 preferred_element_type=jnp.float32) + b1_ref[...]
    h1 = jnp.maximum(h1, 0.0)
    # layer 2 + ReLU
    h2 = jnp.dot(h1.astype(cdt), w2_ref[...],
                 preferred_element_type=jnp.float32) + b2_ref[...]
    h2 = jnp.maximum(h2, 0.0)
    # layer 3 (no activation), true n_actions output width
    o_ref[...] = (jnp.dot(h2.astype(cdt), w3_ref[...],
                          preferred_element_type=jnp.float32)
                  + b3_ref[...]).astype(o_ref.dtype)


def prepare_params(params, *, use_bf16=False):
    """One-time layout prep: biases -> (1, N); weights optionally pre-cast to bf16.

    Call once at init / after each optimizer step, NOT per forward.
    """
    wdt = jnp.bfloat16 if use_bf16 else jnp.float32
    prep = {}
    for name, v in params.items():
        v = jnp.asarray(v)
        if name.startswith("b") and v.ndim == 1:
            v = v[None, :]
        prep[name] = v.astype(wdt if name.startswith("w") else jnp.float32)
    return prep


def dqn_forward(x, prepared, *, tb=None):
    """x: (B, n_obs) float32.  prepared: output of prepare_params()."""
    B, n_obs = x.shape
    hidden = prepared["w1"].shape[1]
    n_actions = prepared["w3"].shape[1]

    if tb is None:
        tb = _choose_tb(B)
    tb = max(8, _round_up(tb, 8))
    grid = (pl.cdiv(B, tb),)

    # Weights/biases: full blocks with constant index_map -> resident across grid.
    const = lambda shape: pl.BlockSpec(shape, lambda i: (0, 0))

    flops = 2 * B * (n_obs * hidden + hidden * hidden + hidden * n_actions)
    param_bytes = sum(int(v.size) * v.dtype.itemsize for v in prepared.values())
    bytes_accessed = (int(x.size) * x.dtype.itemsize + param_bytes
                      + B * n_actions * 4)

    return pl.pallas_call(
        dqn_kernel,
        out_shape=jax.ShapeDtypeStruct((B, n_actions), jnp.float32),
        grid_spec=pltpu.PrefetchScalarGridSpec(
            num_scalar_prefetch=0,
            grid=grid,
            in_specs=[
                pl.BlockSpec((tb, n_obs), lambda i: (i, 0)),   # x: batch-tiled
                const((n_obs, hidden)),                        # w1 (resident)
                const((1, hidden)),                            # b1
                const((hidden, hidden)),                       # w2
                const((1, hidden)),                            # b2
                const((hidden, n_actions)),                    # w3 (true width)
                const((1, n_actions)),                         # b3
            ],
            out_specs=pl.BlockSpec((tb, n_actions), lambda i: (i, 0)),
        ),
        compiler_params=pltpu.CompilerParams(
            # Batch tiles are independent -> shard across TensorCores (v7x).
            dimension_semantics=("parallel",),
        ),
        cost_estimate=pl.CostEstimate(
            flops=flops, transcendentals=0, bytes_accessed=bytes_accessed),
    )(x, prepared["w1"], prepared["b1"], prepared["w2"], prepared["b2"],
      prepared["w3"], prepared["b3"])


def init_dqn_params(key, n_observations, n_actions, hidden=128):
    """PyTorch nn.Linear default init U(-1/sqrt(fan_in), +), stored as (in, out)."""
    def linear(k, fan_in, fan_out):
        kw, kb = jax.random.split(k)
        bound = 1.0 / jnp.sqrt(fan_in)
        w = jax.random.uniform(kw, (fan_in, fan_out), jnp.float32, -bound, bound)
        b = jax.random.uniform(kb, (1, fan_out), jnp.float32, -bound, bound)
        return w, b

    k1, k2, k3 = jax.random.split(key, 3)
    w1, b1 = linear(k1, n_observations, hidden)
    w2, b2 = linear(k2, hidden, hidden)
    w3, b3 = linear(k3, hidden, n_actions)
    return dict(w1=w1, b1=b1, w2=w2, b2=b2, w3=w3, b3=b3)


def dqn_reference(x, p):
    h1 = jnp.maximum(x @ p["w1"] + p["b1"], 0.0)
    h2 = jnp.maximum(h1 @ p["w2"] + p["b2"], 0.0)
    return h2 @ p["w3"] + p["b3"]


if __name__ == "__main__":
    # CartPole: n_observations = 4, n_actions = 2.
    n_observations, n_actions, hidden = 4, 2, 128

    key = jax.random.PRNGKey(0)
    kx, kp, kx2 = jax.random.split(key, 3)
    params = init_dqn_params(kp, n_observations, n_actions, hidden)

    # Params prepared ONCE (layout + optional cast hoisted out of the forward).
    prepared = prepare_params(params)

    # Online-inference path: whole forward under one jit, params captured as
    # constants so no per-step pad/slice/cast ops are launched separately.
    forward = jax.jit(lambda xb: dqn_forward(xb, prepared))

    # --- small single-step batch (grid=(1,), everything resident) ---
    B = 8
    x = jax.random.normal(kx, (B, n_observations), jnp.float32)
    out = jax.block_until_ready(forward(x))
    ref = dqn_reference(x, params)
    assert out.shape == (B, n_actions)
    assert jnp.allclose(out, ref, atol=1e-5, rtol=1e-5), "f32 small-batch mismatch"

    # --- larger batch: multi-tile grid with a ragged final tile (tb=256, grid=(2,)) ---
    B2 = 500
    x2 = jax.random.normal(kx2, (B2, n_observations), jnp.float32)
    out2 = jax.block_until_ready(dqn_forward(x2, prepared))
    ref2 = dqn_reference(x2, params)
    assert out2.shape == (B2, n_actions)
    assert jnp.allclose(out2, ref2, atol=1e-5, rtol=1e-5), "f32 large-batch mismatch"

    # --- bf16 MXU-operand path (weights pre-cast once), f32 accumulation ---
    # NOTE: bf16 operands quantize Q-values to ~1e-2; acceptable for DQN.
    prepared_bf16 = prepare_params(params, use_bf16=True)
    out_bf = jax.block_until_ready(dqn_forward(x2, prepared_bf16))
    assert out_bf.shape == (B2, n_actions)
    assert jnp.allclose(out_bf, ref2, atol=3e-2, rtol=3e-2), "bf16 path mismatch"

    print("KERNEL_OK")
</pallas_src>

<mosaic_0001>
module attributes {stable_mosaic.version = 11 : i64} {
  func.func @dqn_kernel(%arg0: i32, %arg1: memref<8x4xf32, #tpu.memory_space<vmem>>, %arg2: memref<4x128xf32, #tpu.memory_space<vmem>>, %arg3: memref<1x128xf32, #tpu.memory_space<vmem>>, %arg4: memref<128x128xf32, #tpu.memory_space<vmem>>, %arg5: memref<1x128xf32, #tpu.memory_space<vmem>>, %arg6: memref<128x2xf32, #tpu.memory_space<vmem>>, %arg7: memref<1x2xf32, #tpu.memory_space<vmem>>, %arg8: memref<8x2xf32, #tpu.memory_space<vmem>>) attributes {dimension_semantics = [#tpu.dimension_semantics<parallel>], iteration_bounds = array<i64: 1>, scalar_prefetch = 0 : i64, scratch_operands = 0 : i64, tpu.core_type = #tpu.core_type<tc>, window_params = [{transform_indices = @transform_0, window_bounds = array<i64: 8, 4>}, {pipeline_mode = #tpu.pipeline_mode<synchronous>, transform_indices = @transform_1, window_bounds = array<i64: 4, 128>}, {pipeline_mode = #tpu.pipeline_mode<synchronous>, transform_indices = @transform_2, window_bounds = array<i64: 1, 128>}, {pipeline_mode = #tpu.pipeline_mode<synchronous>, transform_indices = @transform_3, window_bounds = array<i64: 128, 128>}, {pipeline_mode = #tpu.pipeline_mode<synchronous>, transform_indices = @transform_4, window_bounds = array<i64: 1, 128>}, {pipeline_mode = #tpu.pipeline_mode<synchronous>, transform_indices = @transform_5, window_bounds = array<i64: 128, 2>}, {pipeline_mode = #tpu.pipeline_mode<synchronous>, transform_indices = @transform_6, window_bounds = array<i64: 1, 2>}, {transform_indices = @transform_7, window_bounds = array<i64: 8, 2>}]} {
    %c0 = arith.constant 0 : index
    %c0_0 = arith.constant 0 : index
    %0 = vector.load %arg1[%c0, %c0_0] : memref<8x4xf32, #tpu.memory_space<vmem>>, vector<8x4xf32>
    %c0_1 = arith.constant 0 : index
    %c0_2 = arith.constant 0 : index
    %1 = vector.load %arg2[%c0_1, %c0_2] : memref<4x128xf32, #tpu.memory_space<vmem>>, vector<4x128xf32>
    %cst = arith.constant dense<0.000000e+00> : vector<8x128xf32>
    %2 = tpu.matmul %0, %1, %cst {dimension_numbers = #tpu.dot_dimension_numbers<[1], [0], [0], [1], [0, 0, 1, 1], [], []>} : vector<8x4xf32>, vector<4x128xf32>, vector<8x128xf32> -> vector<8x128xf32>
    %c0_3 = arith.constant 0 : index
    %c0_4 = arith.constant 0 : index
    %3 = vector.load %arg3[%c0_3, %c0_4] : memref<1x128xf32, #tpu.memory_space<vmem>>, vector<1x128xf32>
    %4 = vector.broadcast %3 : vector<1x128xf32> to vector<8x128xf32>
    %5 = arith.addf %2, %4 : vector<8x128xf32>
    %cst_5 = arith.constant 0.000000e+00 : f32
    %6 = vector.broadcast %cst_5 : f32 to vector<8x128xf32>
    %7 = arith.maximumf %5, %6 : vector<8x128xf32>
    %c0_6 = arith.constant 0 : index
    %c0_7 = arith.constant 0 : index
    %8 = vector.load %arg4[%c0_6, %c0_7] : memref<128x128xf32, #tpu.memory_space<vmem>>, vector<128x128xf32>
    %cst_8 = arith.constant dense<0.000000e+00> : vector<8x128xf32>
    %9 = tpu.matmul %7, %8, %cst_8 {dimension_numbers = #tpu.dot_dimension_numbers<[1], [0], [0], [1], [0, 0, 1, 1], [], []>} : vector<8x128xf32>, vector<128x128xf32>, vector<8x128xf32> -> vector<8x128xf32>
    %c0_9 = arith.constant 0 : index
    %c0_10 = arith.constant 0 : index
    %10 = vector.load %arg5[%c0_9, %c0_10] : memref<1x128xf32, #tpu.memory_space<vmem>>, vector<1x128xf32>
    %11 = vector.broadcast %10 : vector<1x128xf32> to vector<8x128xf32>
    %12 = arith.addf %9, %11 : vector<8x128xf32>
    %cst_11 = arith.constant 0.000000e+00 : f32
    %13 = vector.broadcast %cst_11 : f32 to vector<8x128xf32>
    %14 = arith.maximumf %12, %13 : vector<8x128xf32>
    %c0_12 = arith.constant 0 : index
    %c0_13 = arith.constant 0 : index
    %15 = vector.load %arg6[%c0_12, %c0_13] : memref<128x2xf32, #tpu.memory_space<vmem>>, vector<128x2xf32>
    %cst_14 = arith.constant dense<0.000000e+00> : vector<8x2xf32>
    %16 = tpu.matmul %14, %15, %cst_14 {dimension_numbers = #tpu.dot_dimension_numbers<[1], [0], [0], [1], [0, 0, 1, 1], [], []>} : vector<8x128xf32>, vector<128x2xf32>, vector<8x2xf32> -> vector<8x2xf32>
    %c0_15 = arith.constant 0 : index
    %c0_16 = arith.constant 0 : index
    %17 = vector.load %arg7[%c0_15, %c0_16] : memref<1x2xf32, #tpu.memory_space<vmem>>, vector<1x2xf32>
    %18 = vector.broadcast %17 : vector<1x2xf32> to vector<8x2xf32>
    %19 = arith.addf %16, %18 : vector<8x2xf32>
    %c0_17 = arith.constant 0 : index
    %c0_18 = arith.constant 0 : index
    %20 = vector.load %arg8[%c0_17, %c0_18] : memref<8x2xf32, #tpu.memory_space<vmem>>, vector<8x2xf32>
    tpu.vector_store %arg8[%c0_17, %c0_18], %19 {strides = array<i32>} : memref<8x2xf32, #tpu.memory_space<vmem>>, vector<8x2xf32>,
    return
  }
  func.func @transform_0(%arg0: i32) -> (i32, i32) {
    %c0_i32 = arith.constant 0 : i32
    %c0_i32_0 = arith.constant 0 : i32
    return %arg0, %c0_i32 : i32, i32
  }
  func.func @transform_1(%arg0: i32) -> (i32, i32) {
    %c0_i32 = arith.constant 0 : i32
    %c0_i32_0 = arith.constant 0 : i32
    %c0_i32_1 = arith.constant 0 : i32
    return %c0_i32, %c0_i32_0 : i32, i32
  }
  func.func @transform_2(%arg0: i32) -> (i32, i32) {
    %c0_i32 = arith.constant 0 : i32
    %c0_i32_0 = arith.constant 0 : i32
    %c0_i32_1 = arith.constant 0 : i32
    return %c0_i32, %c0_i32_0 : i32, i32
  }
  func.func @transform_3(%arg0: i32) -> (i32, i32) {
    %c0_i32 = arith.constant 0 : i32
    %c0_i32_0 = arith.constant 0 : i32
    %c0_i32_1 = arith.constant 0 : i32
    return %c0_i32, %c0_i32_0 : i32, i32
  }
  func.func @transform_4(%arg0: i32) -> (i32, i32) {
    %c0_i32 = arith.constant 0 : i32
    %c0_i32_0 = arith.constant 0 : i32
    %c0_i32_1 = arith.constant 0 : i32
    return %c0_i32, %c0_i32_0 : i32, i32
  }
  func.func @transform_5(%arg0: i32) -> (i32, i32) {
    %c0_i32 = arith.constant 0 : i32
    %c0_i32_0 = arith.constant 0 : i32
    %c0_i32_1 = arith.constant 0 : i32
    return %c0_i32, %c0_i32_0 : i32, i32
  }
  func.func @transform_6(%arg0: i32) -> (i32, i32) {
    %c0_i32 = arith.constant 0 : i32
    %c0_i32_0 = arith.constant 0 : i32
    %c0_i32_1 = arith.constant 0 : i32
    return %c0_i32, %c0_i32_0 : i32, i32
  }
  func.func @transform_7(%arg0: i32) -> (i32, i32) {
    %c0_i32 = arith.constant 0 : i32
    %c0_i32_0 = arith.constant 0 : i32
    return %arg0, %c0_i32 : i32, i32
  }
}

</mosaic_0001>

<bundles_post_ra>
// kernel: _lambda_.1
= control target key start
LH: loop header
LB: loop body
LE: loop exit
PB: predicated region body
PF: predicated region fallthrough
CT: control target
= control target key end

     0   :  { %12 = vsyncpa [#allocation3], 0  ;;  %s664_s0 = inlined_call_operand.vmem [shape: f32[8,4], index: 0, kind: input, shape index: {}]   ;;  %s665_s1 = inlined_call_operand.vmem [shape: f32[4,128], index: 1, kind: input, shape index: {}]   ;;  %s666_s2 = inlined_call_operand.vmem [shape: f32[1,128], index: 2, kind: input, shape index: {}]   ;;  %s667_s3 = inlined_call_operand.hbm [shape: f32[128,128], index: 3, kind: input, shape index: {}]   ;;  %s668_s4 = inlined_call_operand.vmem [shape: f32[1,128], index: 4, kind: input, shape index: {}]   ;;  %s669_s5 = inlined_call_operand.hbm [shape: f32[128,2], index: 5, kind: input, shape index: {}]   ;;  %s670_s6 = inlined_call_operand.vmem [shape: f32[1,2], index: 6, kind: input, shape index: {}]   ;;  %s671_s7 = inlined_call_operand.vmem [shape: f32[8,2], index: 7, kind: output, shape index: {}]  }
   0x1   :  { %13 = vsyncpa [#allocation5], 0  ;;  %s556_s24 = smov [#allocation2]   ;;  %s508_s28 = scalar_lea.hbm %s667_s3, 2048 }
   0x2   :  { %s25_s25 = sshll.u32 %s556_s24, 4  ;;  %p509_p0 = scmp.ne.s32.totalorder %s667_s3, %s508_s28  ;;  %s26_s25 = int_to_ptr.vmem [resolvable:$true] %s25_s25 }
   0x3   :  { %p512_p1 = scmp.lt.u32.totalorder %s508_s28, %s667_s3 }
   0x5   :  { %p514_p2 = pnand %p512_p1, %p509_p0 }
   0x7   :  { %517 = shalt.err (!%p514_p2)
}
   0x8   :  { %s518_s10 = scalar_lea.vmem %s26_s25, 2048  ;;  %p523_p4 = scmp.lt.s32.totalorder %s26_s25, %s26_s25 }
   0x9   :  { %p519_p3 = scmp.ne.s32.totalorder %s26_s25, %s518_s10  ;;  %p524_p5 = scmp.lt.s32.totalorder %s518_s10, %s518_s10 }
   0xb   :  { %p525_p6 = por %p524_p5, %p523_p4 }
   0xd   :  { %p526_p7 = pnand %p525_p6, %p519_p3 }
   0xf   :  { %529 = shalt.err (!%p526_p7)
}
  0x10   :  { %s557_s11 = smov 128   ;;  %s558_s12 = smov 8  }
  0x11   :  { %31 = dma.hbm_to_vmem [thread:$0]  %s667_s3, 2048, %s26_s25, [#allocation3], %s557_s11, %s557_s11, %s558_s12  }
  0x12   :  { %s559_s15 = smov [#allocation4]   ;;  %s530_s19 = scalar_lea.hbm %s669_s5, 2048 }
  0x13   :  { %s39_s16 = sshll.u32 %s559_s15, 4  ;;  %p531_p8 = scmp.ne.s32.totalorder %s669_s5, %s530_s19  ;;  %s40_s16 = int_to_ptr.vmem [resolvable:$true] %s39_s16 }
  0x14   :  { %p534_p9 = scmp.lt.u32.totalorder %s530_s19, %s669_s5 }
  0x16   :  { %p536_p10 = pnand %p534_p9, %p531_p8 }
  0x18   :  { %539 = shalt.err (!%p536_p10)
}
  0x19   :  { %s540_s24 = scalar_lea.vmem %s40_s16, 2048  ;;  %p545_p12 = scmp.lt.s32.totalorder %s40_s16, %s40_s16 }
  0x1a   :  { %p541_p11 = scmp.ne.s32.totalorder %s40_s16, %s540_s24  ;;  %p546_p13 = scmp.lt.s32.totalorder %s540_s24, %s540_s24 }
  0x1c   :  { %p547_p0 = por %p546_p13, %p545_p12 }
  0x1e   :  { %p548_p1 = pnand %p547_p0, %p541_p11 }
  0x20   :  { %551 = shalt.err (!%p548_p1)
}
  0x21   :  { %45 = dma.hbm_to_vmem [thread:$0]  %s669_s5, 2048, %s40_s16, [#allocation5], %s557_s11, %s557_s11, %s558_s12  }
  0x22   :  { %552 = dma.done.wait [#allocation3], 2048  }
  0x23   :  { %553 = vsyncadd [#allocation3], 4294965248 }
  0x24   :  { %554 = dma.done.wait [#allocation5], 2048  }
  0x25   :  { %555 = vsyncadd [#allocation5], 4294965248  ;;  %v560_v0 = vmov 0.0   ;;  %vm561_vm0 = vmmov 0   ;;  %v562_v1 = vmov 0.0|0.0   ;;  %vm67_vm1 = vcmask 1043456  }
  0x26   :  { %378 = vmatprep.subr.mxu0 %v560_v0  ;;  %380 = vmatprep.mubr.msk.f32.mxu0 %vm561_vm0, %v560_v0  ;;  %vm63_vm2 = vcmask 31744   ;;  %v55_v2 = vld [vmem:[%s665_s1] sm:$0xf]  ;;  %v143_v5 = vld [vmem:[#allocation2 + $0x8] sm:$0xff]  ;;  %v144_v6 = vld [vmem:[#allocation2 + $0x10] sm:$0xff]  ;;  %vm329_vm3 = vcmask 15360  }
  0x27   :  { %453 = vmatprep.subr.bf16.mxu1 %v562_v1  ;;  %415 = vmatprep.mubr.msk.f32.mxu1 %vm561_vm0, %v560_v0  ;;  %v54_v3 = vld [vmem:[%s664_s0] sm:$0xff]  ;;  %v145_v7 = vld [vmem:[#allocation2 + $0x18] sm:$0xff]  ;;  %v147_v11 = vld [vmem:[#allocation2 + $0x28] sm:$0xff] }
  0x28   :  { %v142_v4 = vld [vmem:[#allocation2] sm:$0xff]  ;;  %379 = vmatpush3.msk.msra.mxu0 %vm67_vm1, %v55_v2  ;;  %v457_v9 = vpack.c.bf16 %v145_v7, %v144_v6  ;;  %v148_v13 = vld [vmem:[#allocation2 + $0x30] sm:$0xff]  ;;  %v149_v14 = vld [vmem:[#allocation2 + $0x38] sm:$0xff] }
  0x29   :  { %381 = vmatmul.mubr.msk.f32.vlgmr.msra.gmra.mrb[0].mxu0 %vm63_vm2, %v54_v3  ;;  %v454_v8 = vpack.c.bf16 %v143_v5, %v142_v4  ;;  %477 = vmatprep.subr.bf16.mxu0 %v562_v1  ;;  %v146_v10 = vld [vmem:[#allocation2 + $0x20] sm:$0xff]  ;;  %v463_v15 = vpack.c.bf16 %v149_v14, %v148_v13  ;;  %v151_v17 = vld [vmem:[#allocation2 + $0x48] sm:$0xff]  ;;  %v152_v19 = vld [vmem:[#allocation2 + $0x50] sm:$0xff] }
  0x2a   :  { %450 = vmatprep.mubr.msk.f32.mxu0 %vm561_vm0, %v560_v0  ;;  %v460_v12 = vpack.c.bf16 %v147_v11, %v146_v10  ;;  %v150_v16 = vld [vmem:[#allocation2 + $0x40] sm:$0xff]  ;;  %v153_v20 = vld [vmem:[#allocation2 + $0x58] sm:$0xff]  ;;  %v155_v23 = vld [vmem:[#allocation2 + $0x68] sm:$0xff] }
  0x2b   :  { %455 = vmatpush3.bf16.msra.mxu1 %v454_v8  ;;  %v466_v18 = vpack.c.bf16 %v151_v17, %v150_v16  ;;  %v469_v21 = vpack.c.bf16 %v153_v20, %v152_v19  ;;  %v154_v22 = vld [vmem:[#allocation2 + $0x60] sm:$0xff]  ;;  %v156_v25 = vld [vmem:[#allocation2 + $0x70] sm:$0xff]  ;;  %v157_v26 = vld [vmem:[#allocation2 + $0x78] sm:$0xff] }
  0x2c   :  { %456 = vmatprep.subr.bf16.mxu1 %v562_v1  ;;  %v472_v24 = vpack.c.bf16 %v155_v23, %v154_v22  ;;  %v475_v27 = vpack.c.bf16 %v157_v26, %v156_v25  ;;  %v236_v28 = vld [vmem:[#allocation4] sm:$0xff]  ;;  %v237_v29 = vld [vmem:[#allocation4 + $0x8] sm:$0xff]  ;;  %v238_v30 = vld [vmem:[#allocation4 + $0x10] sm:$0xff] }
  0x2d   :  { %v478_v31 = vpack.c.bf16 %v237_v29, %v236_v28  ;;  %v239_v32 = vld [vmem:[#allocation4 + $0x18] sm:$0xff]  ;;  %v240_v34 = vld [vmem:[#allocation4 + $0x20] sm:$0xff]  ;;  %v241_v35 = vld [vmem:[#allocation4 + $0x28] sm:$0xff] }
  0x2e   :  { %v481_v33 = vpack.c.bf16 %v239_v32, %v238_v30  ;;  %v484_v36 = vpack.c.bf16 %v241_v35, %v240_v34  ;;  %v242_v37 = vld [vmem:[#allocation4 + $0x30] sm:$0xff]  ;;  %v243_v38 = vld [vmem:[#allocation4 + $0x38] sm:$0xff]  ;;  %v244_v40 = vld [vmem:[#allocation4 + $0x40] sm:$0xff] }
  0x2f   :  { %458 = vmatpush3.bf16.msra.mxu1 %v457_v9  ;;  %479 = vmatpush3.bf16.msra.mxu0 %v478_v31  ;;  %v487_v39 = vpack.c.bf16 %v243_v38, %v242_v37  ;;  %v245_v41 = vld [vmem:[#allocation4 + $0x48] sm:$0xff]  ;;  %v246_v43 = vld [vmem:[#allocation4 + $0x50] sm:$0xff]  ;;  %v247_v44 = vld [vmem:[#allocation4 + $0x58] sm:$0xff] }
  0x30   :  { %459 = vmatprep.subr.bf16.mxu1 %v562_v1  ;;  %480 = vmatprep.subr.bf16.mxu0 %v562_v1  ;;  %v490_v42 = vpack.c.bf16 %v245_v41, %v244_v40  ;;  %v493_v45 = vpack.c.bf16 %v247_v44, %v246_v43  ;;  %v248_v46 = vld [vmem:[#allocation4 + $0x60] sm:$0xff]  ;;  %v249_v47 = vld [vmem:[#allocation4 + $0x68] sm:$0xff]  ;;  %v250_v54 = vld [vmem:[#allocation4 + $0x70] sm:$0xff] }
  0x31   :  { %v496_v48 = vpack.c.bf16 %v249_v47, %v248_v46  ;;  %v337_v49 = vld [vmem:[%s666_s2] ss:$0 sm:$0xff]  ;;  %v251_v55 = vld [vmem:[#allocation4 + $0x78] sm:$0xff] }
  0x32   :  { %v499_v56 = vpack.c.bf16 %v251_v55, %v250_v54  ;;  %v340_v57 = vld [vmem:[%s668_s4] ss:$0 sm:$0xff] }
  0x33   :  { %461 = vmatpush3.bf16.msra.mxu1 %v460_v12  ;;  %482 = vmatpush3.bf16.msra.mxu0 %v481_v33  ;;  %v341_v62 = vld [vmem:[%s670_s6] ss:$0 sm:$0xff] }
  0x34   :  { %462 = vmatprep.subr.bf16.mxu1 %v562_v1  ;;  %483 = vmatprep.subr.bf16.mxu0 %v562_v1 }
  0x37   :  { %464 = vmatpush3.bf16.msra.mxu1 %v463_v15  ;;  %485 = vmatpush3.bf16.msra.mxu0 %v484_v36 }
  0x38   :  { %465 = vmatprep.subr.bf16.mxu1 %v562_v1  ;;  %486 = vmatprep.subr.bf16.mxu0 %v562_v1 }
  0x3b   :  { %467 = vmatpush3.bf16.msra.mxu1 %v466_v18  ;;  %488 = vmatpush3.bf16.msra.mxu0 %v487_v39 }
  0x3c   :  { %468 = vmatprep.subr.bf16.mxu1 %v562_v1  ;;  %489 = vmatprep.subr.bf16.mxu0 %v562_v1 }
  0x3f   :  { %470 = vmatpush3.bf16.msra.mxu1 %v469_v21  ;;  %491 = vmatpush3.bf16.msra.mxu0 %v490_v42 }
  0x40   :  { %471 = vmatprep.subr.bf16.mxu1 %v562_v1  ;;  %492 = vmatprep.subr.bf16.mxu0 %v562_v1 }
  0x43   :  { %473 = vmatpush3.bf16.msra.mxu1 %v472_v24  ;;  %494 = vmatpush3.bf16.msra.mxu0 %v493_v45 }
  0x44   :  { %474 = vmatprep.subr.bf16.mxu1 %v562_v1  ;;  %495 = vmatprep.subr.bf16.mxu0 %v562_v1 }
  0x47   :  { %476 = vmatpush3.bf16.msra.mxu1 %v475_v27  ;;  %497 = vmatpush3.bf16.msra.mxu0 %v496_v48 }
  0x48   :  { %498 = vmatprep.subr.bf16.mxu0 %v562_v1 }
  0x4b   :  { %500 = vmatpush3.bf16.msra.mxu0 %v499_v56 }
  0xfc   :  { %v137_v50 = vpop.f32.mrb[0].mxu0 }
  0xfd   :  { %v138_v51 = vadd.f32 %v337_v49, %v137_v50  ;;  %v382_v52 = vpop.f32.mrb[1].mxu0 }
  0xff   :  { %v141_v53 = vmax.f32 %v138_v51, 0.0 }
 0x101   :  { %416 = vmatmul.mubr.f32.vlgmr.msra.gmra.mrb[0].mxu1 %v141_v53 }
 0x1d4   :  { %v231_v58 = vpop.f32.mrb[0].mxu1 }
 0x1d5   :  { %v232_v59 = vadd.f32 %v340_v57, %v231_v58  ;;  %v417_v60 = vpop.f32.mrb[1].mxu1 }
 0x1d7   :  { %v235_v61 = vmax.f32 %v232_v59, 0.0 }
 0x1d9   :  { %451 = vmatmul.mubr.f32.vlgmr.msra.gmra.mrb[2].mxu0 %v235_v61 }
 0x2ac   :  { %v325_v63 = vpop.f32.mrb[2].mxu0 }
 0x2ad   :  { %v326_v0 = vadd.f32 %v341_v62, %v325_v63  ;;  %v452_v1 = vpop.f32.mrb[3].mxu0 }
 0x2af   :  { %330 = vst.msk [vmem:[%s671_s7] sm:$0xff] %vm329_vm3, %v326_v0 }
 0x2b0   :  { %335 = vsyncpa [#allocation3], 1 }
 0x2b1   :  { %336 = vsyncpa [#allocation5], 1 }

</bundles_post_ra>
